<compile_context>
chip_gen: v5e
topology: v5e:2x2
jax: 0.10.0
libtpu: 0.0.40
codegen_flags: <defaults>
</compile_context>

<pallas_src>
import jax
import jax.numpy as jnp
from jax.experimental import pallas as pl
from jax.experimental.pallas import tpu as pltpu

IN_FEATURES = 10    # K
OUT_FEATURES = 20   # N


def _linear_add_relu_t_kernel(w_ref, b_ref, xT_ref, otherT_ref, oT_ref):
    # w_ref:      (N, K)   f32  -- PyTorch Linear weight, native layout
    # b_ref:      (N, 1)   f32
    # xT_ref:     (K, TM)  f32  -- batch on the lane axis
    # otherT_ref: (N, TM)  f32
    # oT_ref:     (N, TM)  f32
    acc = jnp.dot(w_ref[...], xT_ref[...], preferred_element_type=jnp.float32)
    v2 = acc + b_ref[...] + otherT_ref[...]
    oT_ref[...] = jnp.maximum(v2, 0.0).astype(oT_ref.dtype)


def linear_add_relu_t(xT, weight, bias, otherT, *, tm=512):
    """Lane-dense entry point.

    xT:     (K, M)   = x2 transposed
    weight: (N, K)   = PyTorch Linear weight (native layout, no transpose)
    bias:   (N,)
    otherT: (N, M)   = other transposed
    returns (N, M)   = relu(x2 @ W^T + b + other) transposed
    """
    K, M = xT.shape
    N = weight.shape[0]
    assert K == IN_FEATURES and N == OUT_FEATURES

    # Block over M: full-extent for small M, otherwise a multiple-of-128 tile
    # (>=512 rows keeps DMA near the HBM roofline). Boundary blocks are
    # masked on store, and each output column depends only on the matching
    # input column, so a partial last block is still correct.
    block_m = M if M <= tm else tm
    grid_m = pl.cdiv(M, block_m)

    b_2d = bias.reshape(N, 1)

    return pl.pallas_call(
        _linear_add_relu_t_kernel,
        out_shape=jax.ShapeDtypeStruct((N, M), jnp.float32),
        grid=(grid_m,),
        in_specs=[
            pl.BlockSpec((N, K), lambda i: (0, 0)),          # weight (resident)
            pl.BlockSpec((N, 1), lambda i: (0, 0)),          # bias   (resident)
            pl.BlockSpec((K, block_m), lambda i: (0, i)),    # x^T tile
            pl.BlockSpec((N, block_m), lambda i: (0, i)),    # other^T tile
        ],
        out_specs=pl.BlockSpec((N, block_m), lambda i: (0, i)),
        compiler_params=pltpu.CompilerParams(
            dimension_semantics=("parallel",)),              # megacore on v7x
    )(weight, b_2d, xT, otherT)


def linear_add_relu(x2, weight, bias, other, *, tm=512):
    """PyTorch-layout wrapper.

    x2: (M, 10); weight: (20, 10); bias: (20,); other: (M, 20)
    returns (M, 20) = relu(Linear(x2) + other)

    The transposes here are pure layout plumbing so the kernel sees a
    lane-dense (batch-on-lanes) problem; callers that already hold
    transposed activations should use `linear_add_relu_t` directly.
    """
    out_t = linear_add_relu_t(x2.T, weight, bias, other.T, tm=tm)
    return out_t.T


if __name__ == "__main__":
    key = jax.random.PRNGKey(0)
    k_x, k_o, k_w, k_b = jax.random.split(key, 4)

    # NOTE: the original script's global tensors (x2=(10,500), other=(20,500))
    # are inconsistent with Linear(10, 20); we use the shapes implied by the
    # forward pass: x2=(M,10), other=(M,20). M=512 (~the original 500) keeps
    # the batch on a full 128-lane multiple; tm=256 exercises a 2-step grid.
    M = 512
    x2 = jax.random.normal(k_x, (M, IN_FEATURES), dtype=jnp.float32)
    other = jax.random.normal(k_o, (M, OUT_FEATURES), dtype=jnp.float32)

    # Deterministic PyTorch-style Linear init: U(-1/sqrt(in), 1/sqrt(in)).
    bound = 1.0 / (IN_FEATURES ** 0.5)
    weight = jax.random.uniform(
        k_w, (OUT_FEATURES, IN_FEATURES), minval=-bound, maxval=bound,
        dtype=jnp.float32)
    bias = jax.random.uniform(
        k_b, (OUT_FEATURES,), minval=-bound, maxval=bound, dtype=jnp.float32)

    out = linear_add_relu(x2, weight, bias, other, tm=256)
    out = jax.block_until_ready(out)

    # Cross-check against plain JAX reference of the PyTorch forward pass.
    ref = jnp.maximum(x2 @ weight.T + bias + other, 0.0)
    assert out.shape == (M, OUT_FEATURES)
    assert jnp.allclose(out, ref, atol=1e-5, rtol=1e-5)

    print("KERNEL_OK")
</pallas_src>

<mosaic_0001>
module attributes {stable_mosaic.version = 11 : i64} {
  func.func @_linear_add_relu_t_kernel(%arg0: i32, %arg1: memref<20x10xf32, #tpu.memory_space<vmem>>, %arg2: memref<20x1xf32, #tpu.memory_space<vmem>>, %arg3: memref<10x256xf32, #tpu.memory_space<vmem>>, %arg4: memref<20x256xf32, #tpu.memory_space<vmem>>, %arg5: memref<20x256xf32, #tpu.memory_space<vmem>>) attributes {dimension_semantics = [#tpu.dimension_semantics<parallel>], iteration_bounds = array<i64: 2>, scalar_prefetch = 0 : i64, scratch_operands = 0 : i64, tpu.core_type = #tpu.core_type<tc>, window_params = [{pipeline_mode = #tpu.pipeline_mode<synchronous>, transform_indices = @transform_0, window_bounds = array<i64: 20, 10>}, {pipeline_mode = #tpu.pipeline_mode<synchronous>, transform_indices = @transform_1, window_bounds = array<i64: 20, 1>}, {transform_indices = @transform_2, window_bounds = array<i64: 10, 256>}, {transform_indices = @transform_3, window_bounds = array<i64: 20, 256>}, {transform_indices = @transform_4, window_bounds = array<i64: 20, 256>}]} {
    %c0 = arith.constant 0 : index
    %c0_0 = arith.constant 0 : index
    %0 = vector.load %arg1[%c0, %c0_0] : memref<20x10xf32, #tpu.memory_space<vmem>>, vector<20x10xf32>
    %c0_1 = arith.constant 0 : index
    %c0_2 = arith.constant 0 : index
    %1 = vector.load %arg3[%c0_1, %c0_2] : memref<10x256xf32, #tpu.memory_space<vmem>>, vector<10x256xf32>
    %cst = arith.constant dense<0.000000e+00> : vector<20x256xf32>
    %2 = tpu.matmul %0, %1, %cst {dimension_numbers = #tpu.dot_dimension_numbers<[1], [0], [0], [1], [0, 0, 1, 1], [], []>} : vector<20x10xf32>, vector<10x256xf32>, vector<20x256xf32> -> vector<20x256xf32>
    %c0_3 = arith.constant 0 : index
    %c0_4 = arith.constant 0 : index
    %3 = vector.load %arg2[%c0_3, %c0_4] : memref<20x1xf32, #tpu.memory_space<vmem>>, vector<20x1xf32>
    %4 = vector.broadcast %3 : vector<20x1xf32> to vector<20x256xf32>
    %5 = arith.addf %2, %4 : vector<20x256xf32>
    %c0_5 = arith.constant 0 : index
    %c0_6 = arith.constant 0 : index
    %6 = vector.load %arg4[%c0_5, %c0_6] : memref<20x256xf32, #tpu.memory_space<vmem>>, vector<20x256xf32>
    %7 = arith.addf %5, %6 : vector<20x256xf32>
    %cst_7 = arith.constant 0.000000e+00 : f32
    %8 = vector.broadcast %cst_7 : f32 to vector<20x256xf32>
    %9 = arith.maximumf %7, %8 : vector<20x256xf32>
    %c0_8 = arith.constant 0 : index
    %c0_9 = arith.constant 0 : index
    %10 = vector.load %arg5[%c0_8, %c0_9] : memref<20x256xf32, #tpu.memory_space<vmem>>, vector<20x256xf32>
    tpu.vector_store %arg5[%c0_8, %c0_9], %9 {strides = array<i32>} : memref<20x256xf32, #tpu.memory_space<vmem>>, vector<20x256xf32>,
    return
  }
  func.func @transform_0(%arg0: i32) -> (i32, i32) {
    %c0_i32 = arith.constant 0 : i32
    %c0_i32_0 = arith.constant 0 : i32
    %c0_i32_1 = arith.constant 0 : i32
    return %c0_i32, %c0_i32_0 : i32, i32
  }
  func.func @transform_1(%arg0: i32) -> (i32, i32) {
    %c0_i32 = arith.constant 0 : i32
    %c0_i32_0 = arith.constant 0 : i32
    %c0_i32_1 = arith.constant 0 : i32
    return %c0_i32, %c0_i32_0 : i32, i32
  }
  func.func @transform_2(%arg0: i32) -> (i32, i32) {
    %c0_i32 = arith.constant 0 : i32
    %c0_i32_0 = arith.constant 0 : i32
    return %c0_i32, %arg0 : i32, i32
  }
  func.func @transform_3(%arg0: i32) -> (i32, i32) {
    %c0_i32 = arith.constant 0 : i32
    %c0_i32_0 = arith.constant 0 : i32
    return %c0_i32, %arg0 : i32, i32
  }
  func.func @transform_4(%arg0: i32) -> (i32, i32) {
    %c0_i32 = arith.constant 0 : i32
    %c0_i32_0 = arith.constant 0 : i32
    return %c0_i32, %arg0 : i32, i32
  }
}

</mosaic_0001>

<bundles_post_ra>
// kernel: tpu_custom_call.1
= control target key start
LH: loop header
LB: loop body
LE: loop exit
PB: predicated region body
PF: predicated region fallthrough
CT: control target
= control target key end

     0   :  { %s863_s0 = inlined_call_operand.vmem [shape: f32[20,10], index: 0, kind: input, shape index: {}]   ;;  %s864_s1 = inlined_call_operand.vmem [shape: f32[20,1], index: 1, kind: input, shape index: {}]   ;;  %s865_s2 = inlined_call_operand.vmem [shape: f32[10,512], index: 2, kind: input, shape index: {}]   ;;  %s866_s3 = inlined_call_operand.hbm [shape: f32[20,512], index: 3, kind: input, shape index: {}]   ;;  %s867_s4 = inlined_call_operand.hbm [shape: f32[20,512], index: 4, kind: output, shape index: {}]  }
   0x1   :  { %868 = sst [smem:[#allocation9_spill]] %s865_s2 }
   0x2   :  { %9 = vsyncpa [#allocation4], 0 }
   0x3   :  { %11 = vsyncpa [#allocation4 + $0x1], 0 }
   0x4   :  { %12 = vsyncpa [#allocation5], 0 }
   0x5   :  { %14 = vsyncpa [#allocation5 + $0x1], 0  ;;  %s701_s15 = smov 0   ;;  %s703_s16 = smov 0  }
   0x6   :  { %s705_s17 = smov 0   ;;  %s707_s18 = smov 0  }
   0x7 LB: > { %s722_s19 = sadd.s32 4294967295, %s667_s18   ;;  %s492_s20 = sadd.s32 4294967294, %s667_s18   ;;  %s667_s18 = sphi %s707_s18, %s877_s18   ;;  %s663_s17 = sphi %s705_s17, %s876_s17   ;;  %s659_s16 = sphi %s703_s16, %s875_s16   ;;  %s655_s15 = sphi %s701_s15, %s874_s15  }
   0x8   : > { %s726_s21 = sadd.s32 1, %s667_s18   ;;  %s69_s22 = sadd.s32 1, %s663_s17 }
   0x9   : > { %s66_s23 = ssub.s32 %s667_s18, %s726_s21  ;;  %p76_p0 = scmp.ne.s32.totalorder %s663_s17, %s659_s16 }
   0xa   : > { %p67_p1 = scmp.eq.s32.totalorder %s66_s23, 0  ;;  %p77_p2 = scmp.eq.s32.totalorder %s667_s18, 0 }
   0xb   : > { %p108_p3 = scmp.ne.s32.totalorder %s659_s16, %s655_s15  ;;  %p109_p4 = scmp.eq.s32.totalorder %s722_s19, 0 }
   0xc   : > { %s738_s24 = scalar_select %p67_p1, %s663_s17, %s69_s22  }
   0xd   : > { %p740_p5 = por %p77_p2, %p76_p0  ;;  %p744_p6 = por %p109_p4, %p108_p3 }
   0xe   : > { %p132_p7 = scmp.eq.s32.totalorder %s722_s19, 1  ;;  %p138_p8 = scmp.eq.s32.totalorder %s492_s20, 1 }
   0xf   : > { %p494_p11 = scmp.ge.s32.totalorder %s667_s18, 2 }
  0x10   : > { %p749_p9 = por %p132_p7, %p76_p0  ;;  %p753_p10 = por %p138_p8, %p108_p3 }
  0x11   : > { %160 = sbr.rel (%p494_p11) target bundleno = 53 (0x35), region = 24 }
  0x16   : > { %163 = sbr.rel (!%p740_p5) target bundleno = 36 (0x24), region = 28  ;;  %s165_s29 = sand.u32 (%p740_p5), 1, %s663_s17  }
  0x17   : > { %s514_s30 = sshll.u32 (%p740_p5), %s667_s18, 4  ;;  %s495_s5 = sshll.u32 (%p740_p5), %s165_s29, 5 }
  0x18   : > { %s873_s2 = sld [smem:[#allocation9_spill]] (%p740_p5)  ;;  %s167_s9 = scalar_lea.vmem (%p740_p5), [#allocation2], %s495_s5 }
  0x1e   : > { %s170_s8 = scalar_lea.vmem %s873_s2, %s514_s30 }
  0x1f   : > { %v183_v0 = vld [vmem:[%s170_s8] sm:$0xff]  ;;  %v185_v1 = vld [vmem:[%s170_s8 + $0x8] sm:$0xff] }
  0x20   : > { %v187_v2 = vld [vmem:[%s170_s8 + $0x20] sm:$0xff]  ;;  %184 = vst [vmem:[%s167_s9] sm:$0xff] %v183_v0  ;;  %v189_v3 = vld [vmem:[%s170_s8 + $0x28] sm:$0xff] }
  0x21   : > { %186 = vst [vmem:[%s167_s9 + $0x8] sm:$0xff] %v185_v1 }
  0x22   : > { %188 = vst [vmem:[%s167_s9 + $0x10] sm:$0xff] %v187_v2 }
  0x23   : > { %190 = vst [vmem:[%s167_s9 + $0x18] sm:$0xff] %v189_v3 }
  0x24 PF: > { %s197_s10 = sand.u32 1, %s663_s17   ;;  %s515_s11 = sshll.u32 %s667_s18, 4 }
  0x25   : > { %s521_s12 = smul.u32 48, %s197_s10  ;;  %s206_s20 = scalar_lea.hbm %s866_s3, %s515_s11 }
  0x26   : > { %s207_s22 = sshll.u32 %s206_s20, 4  ;;  %s198_s30 = scalar_lea.sflag [#allocation4], %s197_s10  ;;  %s208_s22 = int_to_ptr.hbm [resolvable:$true] %s207_s22 }
  0x27   : > { %s201_s23 = scalar_lea.vmem [#allocation3], %s521_s12  ;;  %s573_s5 = sshra.s32 %s208_s22, 4  ;;  %s574_s5 = int_to_ptr.hbm [resolvable:$true] %s573_s5 }
  0x28   : > { %s209_s29 = sshll.u32 %s201_s23, 4  ;;  %s575_s6 = scalar_lea.hbm %s574_s5, 48  ;;  %s210_s29 = int_to_ptr.vmem [resolvable:$true] %s209_s29 }
  0x29   : > { %p576_p12 = scmp.ne.s32.totalorder %s574_s5, %s575_s6  ;;  %s579_s9 = scalar_lea.hbm %s866_s3, 96 }
  0x2a   : > { %p580_p1 = scmp.lt.s32.totalorder %s574_s5, %s866_s3  ;;  %p581_p2 = scmp.lt.s32.totalorder %s579_s9, %s575_s6 }
  0x2b   : > { %p577_p13 = pnand %p576_p12, %p740_p5 }
  0x2c   : > { %p582_p3 = por %p581_p2, %p580_p1 }
  0x2d   : > { %p578_p0 = pneg %p577_p13 }
  0x2f   : > { %p583_p4 = pnand %p582_p3, %p578_p0 }
  0x31   : > { %586 = shalt.err (!%p583_p4)
}
  0x32   : > { %s669_s10 = smov 512   ;;  %s670_s11 = smov 256  }
  0x33   : > { %s671_s12 = smov 16  }
  0x34   : > { %523 = dma.hbm_to_vmem [thread:$0]  (%p740_p5), %s208_s22, 768, %s210_s29, %s198_s30, %s669_s10, %s670_s11, %s671_s12  }
  0x35 PF: > { %p500_p7 = scmp.ge.s32.totalorder %s667_s18, 1  ;;  %p217_p8 = scmp.lt.s32.totalorder %s667_s18, 3 }
  0x37   : > { %p218_p12 = pnand %p500_p7, %p217_p8 }
  0x38   : > { %s785_s2 = sand.u32 (!%p218_p12), 1, %s659_s16  }
  0x39   : > { %221 = sbr.rel (%p218_p12) target bundleno = 220 (0xdc), region = 55  ;;  %s501_s14 = sshll.u32 (!%p218_p12), %s785_s2, 5 }
  0x3a   : > { %s522_s20 = smul.u32 (!%p218_p12), 48, %s785_s2  ;;  %s226_s23 = scalar_lea.vmem (!%p218_p12), [#allocation2], %s501_s14 }
  0x3b   : > { %s231_s25 = scalar_lea.sflag (!%p218_p12), [#allocation4], %s785_s2 }
  0x3c   : > { %s792_s22 = scalar_lea.vmem (!%p218_p12), [#allocation3], %s522_s20 }
  0x3e   : > { %646 = dma.done.wait (%p744_p6), %s231_s25, 768  }
  0x3f   : > { %648 = vsyncadd (%p744_p6), %s231_s25, 4294966528  ;;  %v672_v4 = vmov 0   ;;  %vm302_vm0 = vcmask 1041408   ;;  %v272_v5 = vld [vmem:[%s226_s23 + $0x10] sm:$0x3]  ;;  %v270_v7 = vld [vmem:[%s226_s23] sm:$0xff] }
  0x40   : > { %571 = vset.pattern.permute.xlu0 %v672_v4  ;;  %572 = vset.pattern.permute.xlu1 %v672_v4  ;;  %v273_v6 = vld [vmem:[%s226_s23 + $0x18] sm:$0x3]  ;;  %v271_v8 = vld [vmem:[%s226_s23 + $0x8] sm:$0xff]  ;;  %vm292_vm1 = vcmask 80896   ;;  %v267_v10 = vld [vmem:[%s863_s0] sm:$0xff]  ;;  %s263_s14 = scalar_lea.vmem [#allocation6], %s522_s20 }
  0x41   : > { %517 = vmatpush.msk.msra.mxu2 %vm302_vm0, %v272_v5  ;;  %519 = vmatpush.msk.msra.mxu3 %vm302_vm0, %v273_v6  ;;  %v268_v9 = vld [vmem:[%s863_s0 + $0x8] sm:$0xff]  ;;  %v274_v11 = vld [vmem:[%s864_s1] sm:$0xff]  ;;  %v276_v12 = vld [vmem:[%s864_s1 + $0x10] sm:$0xf]  ;;  %s516_s23 = sshll.u32 %s722_s19, 4  ;;  %s398_s20 = sshll.u32 %s263_s14, 4  ;;  %s399_s20 = int_to_ptr.vmem [resolvable:$true] %s398_s20 }
  0x42   : > { %502 = vmatpush.msk.msra.mxu0 %vm302_vm0, %v272_v5  ;;  %506 = vmatpush.msk.msra.mxu1 %vm302_vm0, %v273_v6  ;;  %v269_v13 = vld [vmem:[%s863_s0 + $0x10] sm:$0xf]  ;;  %v275_v14 = vld [vmem:[%s864_s1 + $0x8] sm:$0xff]  ;;  %s397_s30 = scalar_lea.hbm %s867_s4, %s516_s23  ;;  %s386_s19 = scalar_lea.sflag [#allocation5], %s785_s2 }
  0x43   : > { %518 = vmatpush.msra.mxu2 %v270_v7  ;;  %520 = vmatpush.msra.mxu3 %v271_v8  ;;  %v361_v17 = vld [vmem:[%s792_s22] sm:$0xff]  ;;  %v362_v19 = vld [vmem:[%s792_s22 + $0x8] sm:$0xff]  ;;  %v363_v26 = vld [vmem:[%s792_s22 + $0x10] sm:$0xff]  ;;  %s400_s26 = sshll.u32 %s397_s30, 4  ;;  %s621_s8 = scalar_lea.hbm %s867_s4, 96  ;;  %s401_s26 = int_to_ptr.hbm [resolvable:$true] %s400_s26 }
  0x44   : > { %504 = vmatmul.msk.f32.vlgmr.msra.gmra.mxu2 %vm292_vm1, %v268_v9  ;;  %508 = vmatmul.msk.f32.vlgmr.msra.gmra.mxu3 %vm292_vm1, %v268_v9  ;;  %v364_v28 = vld [vmem:[%s792_s22 + $0x18] sm:$0xff]  ;;  %v365_v39 = vld [vmem:[%s792_s22 + $0x20] sm:$0xf]  ;;  %v366_v41 = vld [vmem:[%s792_s22 + $0x28] sm:$0xf]  ;;  %s615_s5 = sshra.s32 %s401_s26, 4  ;;  %s616_s5 = int_to_ptr.hbm [resolvable:$true] %s615_s5 }
  0x45   : > { %324 = vmatpush.msra.mxu0 %v270_v7  ;;  %350 = vmatpush.msra.mxu1 %v271_v8  ;;  %s617_s6 = scalar_lea.hbm %s616_s5, 48  ;;  %p622_p0 = scmp.lt.s32.totalorder %s616_s5, %s867_s4 }
  0x46   : > { %503 = vmatmul.msk.f32.vlgmr.msra.gmra.mxu0 %vm292_vm1, %v267_v10  ;;  %507 = vmatmul.msk.f32.vlgmr.msra.gmra.mxu1 %vm292_vm1, %v267_v10  ;;  %p618_p5 = scmp.ne.s32.totalorder %s616_s5, %s617_s6  ;;  %p623_p1 = scmp.lt.s32.totalorder %s621_s8, %s617_s6 }
  0x47   : > { %279 = vperm.xlu0 %571, %v274_v11   ;;  %289 = vperm.xlu1 %572, %v276_v12  }
  0x48   : > { %p619_p6 = pnand %p618_p5, %p749_p9  ;;  %p624_p2 = por %p623_p1, %p622_p0 }
  0x4a   : > { %p620_p13 = pneg %p619_p6 }
  0x4c   : > { %505 = vmatmul.msk.f32.gmra.mxu2 %vm292_vm1, %v269_v13  ;;  %509 = vmatmul.msk.f32.gmra.mxu3 %vm292_vm1, %v269_v13  ;;  %p625_p3 = pnand %p624_p2, %p620_p13 }
  0x4f   : > { %284 = vperm.xlu0 %571, %v275_v14  }
  0xb9   : > { %v280_v15 = vpop.permute.xlu0 %279  ;;  %v290_v37 = vpop.permute.xlu1 %289 }
  0xc1   : > { %v285_v22 = vpop.permute.xlu0 %284 }
  0xc3   : > { %v326_v16 = vpop.f32.mrf.mxu0  ;;  %v352_v18 = vpop.f32.mrf.mxu1 }
  0xc4   : > { %v327_v20 = vadd.f32 %v326_v16, %v280_v15  ;;  %v353_v21 = vadd.f32 %v352_v18, %v280_v15 }
  0xc6   : > { %v367_v23 = vadd.f32 %v361_v17, %v327_v20  ;;  %v368_v24 = vadd.f32 %v362_v19, %v353_v21 }
  0xc7   : > { %v329_v25 = vpop.f32.mrf.mxu2  ;;  %v355_v27 = vpop.f32.mrf.mxu3 }
  0xc8   : > { %v373_v29 = vmax.f32 %v367_v23, 0.0  ;;  %v330_v30 = vadd.f32 %v329_v25, %v285_v22  ;;  %v374_v31 = vmax.f32 %v368_v24, 0.0  ;;  %v356_v32 = vadd.f32 %v355_v27, %v285_v22 }
  0xca   : > { %379 = vst [vmem:[%s263_s14] sm:$0xff] %v373_v29  ;;  %v369_v33 = vadd.f32 %v363_v26, %v330_v30  ;;  %v370_v34 = vadd.f32 %v364_v28, %v356_v32 }
  0xcb   : > { %380 = vst [vmem:[%s263_s14 + $0x8] sm:$0xff] %v374_v31 }
  0xcc   : > { %v375_v35 = vmax.f32 %v369_v33, 0.0  ;;  %v376_v36 = vmax.f32 %v370_v34, 0.0 }
  0xce   : > { %381 = vst [vmem:[%s263_s14 + $0x10] sm:$0xff] %v375_v35 }
  0xcf   : > { %382 = vst [vmem:[%s263_s14 + $0x18] sm:$0xff] %v376_v36  ;;  %v332_v38 = vpop.f32.mrf.mxu2  ;;  %v358_v40 = vpop.f32.mrf.mxu3 }
  0xd0   : > { %v333_v42 = vadd.f32 %v332_v38, %v290_v37  ;;  %v359_v43 = vadd.f32 %v358_v40, %v290_v37 }
  0xd2   : > { %v371_v44 = vadd.f32 %v365_v39, %v333_v42  ;;  %v372_v45 = vadd.f32 %v366_v41, %v359_v43 }
  0xd4   : > { %v377_v46 = vmax.f32 %v371_v44, 0.0  ;;  %v378_v47 = vmax.f32 %v372_v45, 0.0 }
  0xd6   : > { %383 = vst [vmem:[%s263_s14 + $0x20] sm:$0xf] %v377_v46 }
  0xd7   : > { %384 = vst [vmem:[%s263_s14 + $0x28] sm:$0xf] %v378_v47 }
  0xd8   : > { %628 = shalt.err (!%p625_p3)
}
  0xd9   : > { %s673_s2 = smov 256   ;;  %s674_s10 = smov 512  }
  0xda   : > { %s675_s11 = smov 16  }
  0xdb   : > { %525 = dma.vmem_to_hbm [thread:$0]  (%p749_p9), %s399_s20, 768, %s401_s26, %s386_s19, %s673_s2, %s674_s10, %s675_s11  }
  0xdc PF: > { %s415_s12 = sand.u32 1, %s655_s15   ;;  %p528_p4 = pnand %p494_p11, %p753_p10 }
  0xdd   : > { %s416_s14 = scalar_lea.sflag [#allocation5], %s415_s12 }
  0xde   : > { %p529_p7 = pneg %p528_p4 }
  0xe0   : > { %650 = dma.done.wait (%p529_p7), %s416_s14, 768  }
  0xe1   : > { %652 = vsyncadd (%p529_p7), %s416_s14, 4294966528  ;;  %p17_p8 = scmp.ge.s32.totalorder %s726_s21, 4   ;;  %s874_s15 = smov %s659_s16 }
  0xe2   : > { %s875_s16 = smov %s663_s17  ;;  %s876_s17 = smov %s738_s24 }
  0xe3   : > { %s877_s18 = smov %s726_s21  ;;  %19 = sbr.rel (!%p17_p8) target bundleno = 7 (0x7), region = 112 }
  0xe8   :  { %422 = vsyncpa [#allocation4], 1 }
  0xe9   :  { %424 = vsyncpa [#allocation4 + $0x1], 1 }
  0xea   :  { %425 = vsyncpa [#allocation5], 1 }
  0xeb   :  { %427 = vsyncpa [#allocation5 + $0x1], 1 }

</bundles_post_ra>
